<compile_context>
chip_gen: v5e
topology: v5e:2x2
jax: 0.10.0
libtpu: 0.0.40
codegen_flags: <defaults>
</compile_context>

<pallas_src>
import jax
import jax.numpy as jnp
from jax.experimental import pallas as pl
from jax.experimental.pallas import tpu as pltpu


def se_layer_kernel(x_ref, w1_ref, w2_ref, o_ref):
    """One batch element of the SELayer forward.

    x_ref  : (1, S, C)   channels-last input slab, S = D*H*W
    w1_ref : (C, Cr)     squeeze FC weights  (conv1x1x1 #1, no bias)
    w2_ref : (Cr, C)     excite  FC weights  (conv1x1x1 #2, no bias)
    o_ref  : (1, S, C)   gated output
    """
    x = x_ref[0]                                           # (S, C), f32
    s = x.shape[0]

    # ---- squeeze: global average pool over the spatial axis ----
    pooled = jnp.sum(x, axis=0, keepdims=True) * (1.0 / s)  # (1, C)

    # ---- excitation MLP: FC -> ReLU -> FC -> sigmoid ----
    h = jnp.maximum(
        jnp.dot(pooled, w1_ref[...], preferred_element_type=jnp.float32),
        0.0)                                               # (1, Cr)
    gate = jax.nn.sigmoid(
        jnp.dot(h, w2_ref[...], preferred_element_type=jnp.float32))  # (1, C)

    # ---- scale: broadcast the per-channel gate over all voxels ----
    o_ref[0] = (x * gate).astype(o_ref.dtype)


def se_layer_forward(x_ncdhw, w1_conv, w2_conv):
    """SELayer forward.

    x_ncdhw : (N, C, D, H, W) float32   (PyTorch NCDHW convention)
    w1_conv : (Cr, C, 1, 1, 1) float32  (nn.Conv3d weight, C -> C//reduction)
    w2_conv : (C, Cr, 1, 1, 1) float32  (nn.Conv3d weight, C//reduction -> C)
    returns : (N, C, D, H, W) float32
    """
    N, C, D, H, W = x_ncdhw.shape
    Cr = w1_conv.shape[0]
    S = D * H * W

    # Channels-last, spatial collapsed: (N, S, C). One transpose at the
    # boundary; the kernel then does exactly one HBM read + one HBM write of x.
    x_sc = jnp.transpose(x_ncdhw, (0, 2, 3, 4, 1)).reshape(N, S, C)

    # 1x1x1 conv weights -> plain matrices for right-multiplication.
    w1 = jnp.transpose(w1_conv.reshape(Cr, C), (1, 0))     # (C, Cr)
    w2 = jnp.transpose(w2_conv.reshape(C, Cr), (1, 0))     # (Cr, C)

    out_sc = pl.pallas_call(
        se_layer_kernel,
        out_shape=jax.ShapeDtypeStruct((N, S, C), jnp.float32),
        grid_spec=pltpu.PrefetchScalarGridSpec(
            num_scalar_prefetch=0,
            grid=(N,),
            in_specs=[
                pl.BlockSpec((1, S, C), lambda n: (n, 0, 0)),
                pl.BlockSpec((C, Cr), lambda n: (0, 0)),
                pl.BlockSpec((Cr, C), lambda n: (0, 0)),
            ],
            out_specs=pl.BlockSpec((1, S, C), lambda n: (n, 0, 0)),
        ),
        compiler_params=pltpu.CompilerParams(
            dimension_semantics=("parallel",),
            vmem_limit_bytes=64 * 1024 * 1024),
    )(x_sc, w1, w2)

    return jnp.transpose(out_sc.reshape(N, D, H, W, C), (0, 4, 1, 2, 3))


if __name__ == "__main__":
    # Small shapes consistent with the module: reduction=16 => channel >= 16.
    N, C, D, H, W = 2, 32, 4, 8, 8
    reduction = 16
    Cr = C // reduction

    key = jax.random.PRNGKey(0)
    k_x, k_w1, k_w2 = jax.random.split(key, 3)

    # Input in PyTorch NCDHW convention.
    x = jax.random.normal(k_x, (N, C, D, H, W), jnp.float32)

    # PyTorch Conv3d weight convention: (out_channels, in_channels, 1, 1, 1).
    w1_conv = jax.random.normal(k_w1, (Cr, C, 1, 1, 1), jnp.float32) * 0.3
    w2_conv = jax.random.normal(k_w2, (C, Cr, 1, 1, 1), jnp.float32) * 0.3

    out = se_layer_forward(x, w1_conv, w2_conv)
    out = jax.block_until_ready(out)

    # Pure-JAX reference (same math) for a correctness check.
    pooled = jnp.mean(x, axis=(2, 3, 4))                           # (N, C)
    h = jnp.maximum(pooled @ w1_conv.reshape(Cr, C).T, 0.0)        # (N, Cr)
    gate = jax.nn.sigmoid(h @ w2_conv.reshape(C, Cr).T)            # (N, C)
    ref = x * gate[:, :, None, None, None]

    assert out.shape == (N, C, D, H, W)
    assert jnp.allclose(out, ref, rtol=1e-3, atol=1e-4), (
        float(jnp.max(jnp.abs(out - ref))))

    print("KERNEL_OK")
</pallas_src>

<mosaic_0001>
module attributes {stable_mosaic.version = 11 : i64} {
  func.func @se_layer_kernel(%arg0: i32, %arg1: memref<1x256x32xf32, #tpu.memory_space<vmem>>, %arg2: memref<32x2xf32, #tpu.memory_space<vmem>>, %arg3: memref<2x32xf32, #tpu.memory_space<vmem>>, %arg4: memref<1x256x32xf32, #tpu.memory_space<vmem>>) attributes {dimension_semantics = [#tpu.dimension_semantics<parallel>], iteration_bounds = array<i64: 2>, scalar_prefetch = 0 : i64, scratch_operands = 0 : i64, tpu.core_type = #tpu.core_type<tc>, window_params = [{transform_indices = @transform_0, window_bounds = array<i64: 1, 256, 32>}, {pipeline_mode = #tpu.pipeline_mode<synchronous>, transform_indices = @transform_1, window_bounds = array<i64: 32, 2>}, {pipeline_mode = #tpu.pipeline_mode<synchronous>, transform_indices = @transform_2, window_bounds = array<i64: 2, 32>}, {transform_indices = @transform_3, window_bounds = array<i64: 1, 256, 32>}]} {
    %c0 = arith.constant 0 : index
    %c0_0 = arith.constant 0 : index
    %c0_1 = arith.constant 0 : index
    %0 = vector.load %arg1[%c0, %c0_0, %c0_1] : memref<1x256x32xf32, #tpu.memory_space<vmem>>, vector<1x256x32xf32>
    %1 = vector.shape_cast %0 : vector<1x256x32xf32> to vector<256x32xf32>
    %cst = arith.constant dense<0.000000e+00> : vector<32xf32>
    %2 = vector.multi_reduction <add>, %1, %cst [0] : vector<256x32xf32> to vector<32xf32>
    %3 = vector.shape_cast %2 : vector<32xf32> to vector<1x32xf32>
    %cst_2 = arith.constant 3.906250e-03 : f32
    %4 = vector.broadcast %cst_2 : f32 to vector<1x32xf32>
    %5 = arith.mulf %3, %4 : vector<1x32xf32>
    %c0_3 = arith.constant 0 : index
    %c0_4 = arith.constant 0 : index
    %6 = vector.load %arg2[%c0_3, %c0_4] : memref<32x2xf32, #tpu.memory_space<vmem>>, vector<32x2xf32>
    %cst_5 = arith.constant dense<0.000000e+00> : vector<1x2xf32>
    %7 = tpu.matmul %5, %6, %cst_5 {dimension_numbers = #tpu.dot_dimension_numbers<[1], [0], [0], [1], [0, 0, 1, 1], [], []>} : vector<1x32xf32>, vector<32x2xf32>, vector<1x2xf32> -> vector<1x2xf32>
    %cst_6 = arith.constant 0.000000e+00 : f32
    %8 = vector.broadcast %cst_6 : f32 to vector<1x2xf32>
    %9 = arith.maximumf %7, %8 : vector<1x2xf32>
    %c0_7 = arith.constant 0 : index
    %c0_8 = arith.constant 0 : index
    %10 = vector.load %arg3[%c0_7, %c0_8] : memref<2x32xf32, #tpu.memory_space<vmem>>, vector<2x32xf32>
    %cst_9 = arith.constant dense<0.000000e+00> : vector<1x32xf32>
    %11 = tpu.matmul %9, %10, %cst_9 {dimension_numbers = #tpu.dot_dimension_numbers<[1], [0], [0], [1], [0, 0, 1, 1], [], []>} : vector<1x2xf32>, vector<2x32xf32>, vector<1x32xf32> -> vector<1x32xf32>
    %12 = arith.negf %11 : vector<1x32xf32>
    %13 = math.exp %12 : vector<1x32xf32>
    %cst_10 = arith.constant 1.000000e+00 : f32
    %14 = vector.broadcast %cst_10 : f32 to vector<1x32xf32>
    %15 = arith.addf %14, %13 : vector<1x32xf32>
    %16 = arith.divf %14, %15 : vector<1x32xf32>
    %17 = vector.broadcast %16 : vector<1x32xf32> to vector<256x32xf32>
    %18 = arith.mulf %1, %17 : vector<256x32xf32>
    %c0_11 = arith.constant 0 : index
    %c0_12 = arith.constant 0 : index
    %c0_13 = arith.constant 0 : index
    %19 = vector.load %arg4[%c0_11, %c0_12, %c0_13] : memref<1x256x32xf32, #tpu.memory_space<vmem>>, vector<1x256x32xf32>
    %20 = vector.shape_cast %19 : vector<1x256x32xf32> to vector<256x32xf32>
    %21 = vector.shape_cast %18 : vector<256x32xf32> to vector<1x256x32xf32>
    tpu.vector_store %arg4[%c0_11, %c0_12, %c0_13], %21 {strides = array<i32>} : memref<1x256x32xf32, #tpu.memory_space<vmem>>, vector<1x256x32xf32>,
    return
  }
  func.func @transform_0(%arg0: i32) -> (i32, i32, i32) {
    %c0_i32 = arith.constant 0 : i32
    %c0_i32_0 = arith.constant 0 : i32
    %c0_i32_1 = arith.constant 0 : i32
    return %arg0, %c0_i32, %c0_i32_0 : i32, i32, i32
  }
  func.func @transform_1(%arg0: i32) -> (i32, i32) {
    %c0_i32 = arith.constant 0 : i32
    %c0_i32_0 = arith.constant 0 : i32
    %c0_i32_1 = arith.constant 0 : i32
    return %c0_i32, %c0_i32_0 : i32, i32
  }
  func.func @transform_2(%arg0: i32) -> (i32, i32) {
    %c0_i32 = arith.constant 0 : i32
    %c0_i32_0 = arith.constant 0 : i32
    %c0_i32_1 = arith.constant 0 : i32
    return %c0_i32, %c0_i32_0 : i32, i32
  }
  func.func @transform_3(%arg0: i32) -> (i32, i32, i32) {
    %c0_i32 = arith.constant 0 : i32
    %c0_i32_0 = arith.constant 0 : i32
    %c0_i32_1 = arith.constant 0 : i32
    return %arg0, %c0_i32, %c0_i32_0 : i32, i32, i32
  }
}

</mosaic_0001>

<bundles_post_ra>
// kernel: tpu_custom_call.1
= control target key start
LH: loop header
LB: loop body
LE: loop exit
PB: predicated region body
PF: predicated region fallthrough
CT: control target
= control target key end

     0   :  { %s527_s12 = smov 0   ;;  %s827_s0 = inlined_call_operand.vmem [shape: f32[2,256,32], index: 0, kind: input, shape index: {}]   ;;  %s828_s1 = inlined_call_operand.vmem [shape: f32[32,2], index: 1, kind: input, shape index: {}]   ;;  %s829_s2 = inlined_call_operand.vmem [shape: f32[2,32], index: 2, kind: input, shape index: {}]   ;;  %s830_s3 = inlined_call_operand.vmem [shape: f32[2,256,32], index: 3, kind: output, shape index: {}]  }
   0x1 LB: > { %s470_s13 = sadd.s32 4294967295, %s505_s12   ;;  %p474_p0 = scmp.ge.s32.totalorder %s505_s12, 1  ;;  %s505_s12 = sphi %s527_s12, %s13_s12  }
   0x2   : > { %p137_p1 = scmp.lt.s32.totalorder %s505_s12, 3 }
   0x4   : > { %p138_p2 = pnand %p474_p0, %p137_p1 }
   0x5   : > { %p161_p3 = scmp.lt.s32.totalorder (!%p138_p2), %s470_s13, 1 }
   0x6   : > { %141 = sbr.rel (%p138_p2) target bundleno = 410 (0x19a), region = 32 }
   0xb   : > { %v277_v0 = vld [vmem:[%s828_s1 + $0x18] sm:$0xff]  ;;  %v276_v1 = vld [vmem:[%s828_s1 + $0x10] sm:$0xff]  ;;  %v275_v2 = vld [vmem:[%s828_s1 + $0x8] sm:$0xff]  ;;  %s832_s13 = smov (!%p161_p3, %s470_s13), 1  ;;  %vm203_vm0 = vcmask 261120   ;;  %vm307_vm1 = vcmask 1041408  }
   0xc   : > { %293 = vmatpush.msra.mxu0 %v277_v0  ;;  %v274_v3 = vld [vmem:[%s828_s1] sm:$0xff]  ;;  %s485_s22 = sshll.u32 %s832_s13, 8  ;;  %vm303_vm2 = vcmask 15360  }
   0xd   : > { %s555_s25 = scalar_lea.vmem %s827_s0, %s485_s22  ;;  %s726_s30 = scalar_lea.vmem %s830_s3, %s485_s22 }
   0xe   : > { %294 = vmatpush.msra.mxu0 %v276_v1  ;;  %v558_v4 = vld [vmem:[%s555_s25] sm:$0xff]  ;;  %v561_v5 = vld [vmem:[%s555_s25 + $0x8] sm:$0xff]  ;;  %v564_v6 = vld [vmem:[%s555_s25 + $0x10] sm:$0xff] }
   0xf   : > { %v567_v7 = vld [vmem:[%s555_s25 + $0x18] sm:$0xff]  ;;  %v204_v8 = vsel %vm203_vm0, %v558_v4, 0.0  ;;  %v205_v9 = vsel %vm203_vm0, %v561_v5, 0.0  ;;  %v207_v10 = vsel %vm203_vm0, %v564_v6, 0.0  ;;  %v576_v11 = vld [vmem:[%s555_s25 + $0x20] sm:$0xff]  ;;  %v581_v14 = vld [vmem:[%s555_s25 + $0x28] sm:$0xff] }
  0x10   : > { %295 = vmatpush.msra.mxu0 %v275_v2  ;;  %v206_v12 = vadd.f32 %v205_v9, %v204_v8  ;;  %v209_v13 = vsel %vm203_vm0, %v567_v7, 0.0  ;;  %v211_v16 = vsel %vm203_vm0, %v576_v11, 0.0  ;;  %v586_v17 = vld [vmem:[%s555_s25 + $0x30] sm:$0xff]  ;;  %v213_v19 = vsel %vm203_vm0, %v581_v14, 0.0  ;;  %v591_v20 = vld [vmem:[%s555_s25 + $0x38] sm:$0xff]  ;;  %v596_v23 = vld [vmem:[%s555_s25 + $0x40] sm:$0xff] }
  0x11   : > { %v215_v22 = vsel %vm203_vm0, %v586_v17, 0.0  ;;  %v217_v25 = vsel %vm203_vm0, %v591_v20, 0.0  ;;  %v601_v26 = vld [vmem:[%s555_s25 + $0x48] sm:$0xff]  ;;  %v219_v28 = vsel %vm203_vm0, %v596_v23, 0.0  ;;  %v606_v29 = vld [vmem:[%s555_s25 + $0x50] sm:$0xff]  ;;  %v611_v32 = vld [vmem:[%s555_s25 + $0x58] sm:$0xff] }
  0x12   : > { %296 = vmatpush.msra.mxu0 %v274_v3  ;;  %v208_v15 = vadd.f32 %v207_v10, %v206_v12  ;;  %v221_v31 = vsel %vm203_vm0, %v601_v26, 0.0  ;;  %v223_v34 = vsel %vm203_vm0, %v606_v29, 0.0  ;;  %v616_v35 = vld [vmem:[%s555_s25 + $0x60] sm:$0xff]  ;;  %v225_v37 = vsel %vm203_vm0, %v611_v32, 0.0  ;;  %v621_v38 = vld [vmem:[%s555_s25 + $0x68] sm:$0xff]  ;;  %v626_v41 = vld [vmem:[%s555_s25 + $0x70] sm:$0xff] }
  0x13   : > { %v227_v40 = vsel %vm203_vm0, %v616_v35, 0.0  ;;  %v229_v43 = vsel %vm203_vm0, %v621_v38, 0.0  ;;  %v631_v44 = vld [vmem:[%s555_s25 + $0x78] sm:$0xff]  ;;  %v231_v46 = vsel %vm203_vm0, %v626_v41, 0.0  ;;  %v636_v47 = vld [vmem:[%s555_s25 + $0x80] sm:$0xff]  ;;  %v641_v50 = vld [vmem:[%s555_s25 + $0x88] sm:$0xff] }
  0x14   : > { %v210_v18 = vadd.f32 %v209_v13, %v208_v15  ;;  %v233_v49 = vsel %vm203_vm0, %v631_v44, 0.0  ;;  %v235_v52 = vsel %vm203_vm0, %v636_v47, 0.0  ;;  %v646_v53 = vld [vmem:[%s555_s25 + $0x90] sm:$0xff]  ;;  %v237_v55 = vsel %vm203_vm0, %v641_v50, 0.0  ;;  %v651_v56 = vld [vmem:[%s555_s25 + $0x98] sm:$0xff]  ;;  %v656_v59 = vld [vmem:[%s555_s25 + $0xa0] sm:$0xff] }
  0x15   : > { %v239_v58 = vsel %vm203_vm0, %v646_v53, 0.0  ;;  %v241_v61 = vsel %vm203_vm0, %v651_v56, 0.0  ;;  %v661_v62 = vld [vmem:[%s555_s25 + $0xa8] sm:$0xff]  ;;  %v243_v0 = vsel %vm203_vm0, %v656_v59, 0.0  ;;  %v666_v1 = vld [vmem:[%s555_s25 + $0xb0] sm:$0xff]  ;;  %v671_v8 = vld [vmem:[%s555_s25 + $0xb8] sm:$0xff] }
  0x16   : > { %v212_v21 = vadd.f32 %v211_v16, %v210_v18  ;;  %v245_v3 = vsel %vm203_vm0, %v661_v62, 0.0  ;;  %v247_v10 = vsel %vm203_vm0, %v666_v1, 0.0  ;;  %v676_v12 = vld [vmem:[%s555_s25 + $0xc0] sm:$0xff]  ;;  %v249_v15 = vsel %vm203_vm0, %v671_v8, 0.0  ;;  %v681_v16 = vld [vmem:[%s555_s25 + $0xc8] sm:$0xff] }
  0x18   : > { %v214_v24 = vadd.f32 %v213_v19, %v212_v21  ;;  %v251_v19 = vsel %vm203_vm0, %v676_v12, 0.0  ;;  %v686_v21 = vld [vmem:[%s555_s25 + $0xd0] sm:$0xff] }
  0x1a   : > { %v216_v27 = vadd.f32 %v215_v22, %v214_v24  ;;  %v253_v24 = vsel %vm203_vm0, %v681_v16, 0.0 }
  0x1c   : > { %v218_v30 = vadd.f32 %v217_v25, %v216_v27  ;;  %v691_v25 = vld [vmem:[%s555_s25 + $0xd8] sm:$0xff] }
  0x1e   : > { %v220_v33 = vadd.f32 %v219_v28, %v218_v30  ;;  %v255_v28 = vsel %vm203_vm0, %v686_v21, 0.0  ;;  %v696_v30 = vld [vmem:[%s555_s25 + $0xe0] sm:$0xff] }
  0x20   : > { %v222_v36 = vadd.f32 %v221_v31, %v220_v33  ;;  %v257_v33 = vsel %vm203_vm0, %v691_v25, 0.0 }
  0x22   : > { %v224_v39 = vadd.f32 %v223_v34, %v222_v36  ;;  %v701_v34 = vld [vmem:[%s555_s25 + $0xe8] sm:$0xff] }
  0x24   : > { %v226_v42 = vadd.f32 %v225_v37, %v224_v39  ;;  %v259_v37 = vsel %vm203_vm0, %v696_v30, 0.0  ;;  %v706_v39 = vld [vmem:[%s555_s25 + $0xf0] sm:$0xff] }
  0x26   : > { %v228_v45 = vadd.f32 %v227_v40, %v226_v42  ;;  %v261_v42 = vsel %vm203_vm0, %v701_v34, 0.0 }
  0x28   : > { %v230_v48 = vadd.f32 %v229_v43, %v228_v45  ;;  %v711_v43 = vld [vmem:[%s555_s25 + $0xf8] sm:$0xff] }
  0x2a   : > { %v232_v51 = vadd.f32 %v231_v46, %v230_v48  ;;  %v263_v46 = vsel %vm203_vm0, %v706_v39, 0.0 }
  0x2c   : > { %v234_v54 = vadd.f32 %v233_v49, %v232_v51  ;;  %v265_v49 = vsel %vm203_vm0, %v711_v43, 0.0 }
  0x2e   : > { %v236_v57 = vadd.f32 %v235_v52, %v234_v54 }
  0x30   : > { %v238_v60 = vadd.f32 %v237_v55, %v236_v57 }
  0x32   : > { %v240_v63 = vadd.f32 %v239_v58, %v238_v60 }
  0x34   : > { %v242_v2 = vadd.f32 %v241_v61, %v240_v63 }
  0x36   : > { %v244_v9 = vadd.f32 %v243_v0, %v242_v2  ;;  %v302_v0 = vld [vmem:[%s829_s2] sm:$0x3] }
  0x37   : > { %480 = vmatpush.msk.msra.mxu1 %vm307_vm1, %v302_v0 }
  0x38   : > { %v246_v13 = vadd.f32 %v245_v3, %v244_v9 }
  0x3a   : > { %v248_v18 = vadd.f32 %v247_v10, %v246_v13 }
  0x3c   : > { %v250_v22 = vadd.f32 %v249_v15, %v248_v18 }
  0x3e   : > { %v252_v27 = vadd.f32 %v251_v19, %v250_v22 }
  0x40   : > { %v254_v31 = vadd.f32 %v253_v24, %v252_v27 }
  0x42   : > { %v256_v36 = vadd.f32 %v255_v28, %v254_v31 }
  0x44   : > { %v258_v40 = vadd.f32 %v257_v33, %v256_v36 }
  0x46   : > { %v260_v45 = vadd.f32 %v259_v37, %v258_v40 }
  0x48   : > { %v262_v48 = vadd.f32 %v261_v42, %v260_v45 }
  0x4a   : > { %v264_v51 = vadd.f32 %v263_v46, %v262_v48 }
  0x4c   : > { %v266_v52 = vadd.f32 %v265_v49, %v264_v51 }
  0x4e   : > { %v267_v54 = vrot.slane %v266_v52, 4 }
  0x50   : > { %v268_v55 = vadd.f32 %v267_v54, %v266_v52 }
  0x52   : > { %v269_v57 = vrot.slane %v268_v55, 2 }
  0x54   : > { %v270_v58 = vadd.f32 %v269_v57, %v268_v55 }
  0x56   : > { %v271_v60 = vrot.slane %v270_v58, 1 }
  0x58   : > { %v272_v61 = vadd.f32 %v271_v60, %v270_v58 }
  0x5a   : > { %v273_v63 = vmul.f32 0.00390625, %v272_v61 }
  0x5c   : > { %479 = vmatmul.msk.f32.vlgmr.msra.gmra.mxu0 %vm203_vm0, %v273_v63 }
  0xd9   : > { %v298_v2 = vpop.f32.mrf.mxu0 }
  0xda   : > { %v301_v3 = vmax.f32 %v298_v2, 0.0 }
  0xdc   : > { %481 = vmatmul.msk.f32.vlgmr.msra.gmra.mxu1 %vm303_vm2, %v301_v3 }
 0x159   : > { %v328_v9 = vpop.f32.mrf.mxu1 }
 0x15a   : > { %v482_v10 = vmul.f32 -1.442695, %v328_v9 }
 0x15c   : > { %495 = vpow2.f32 %v482_v10 }
 0x162   : > { %v496_v13 = vpop.eup %495 }
 0x163   : > { %v334_v15 = vadd.f32 1.0, %v496_v13 }
 0x165   : > { %497 = vrcp.f32 %v334_v15  ;;  %v346_v24 = vand.u32 2147483648, %v334_v15  ;;  %v344_v28 = vand.u32 2147483647, %v334_v15  ;;  %vm340_vm4 = vweird.f32 %v334_v15 }
 0x167   : > { %v347_v33 = vor.u32 1.1754944e-38, %v346_v24  ;;  %vm345_vm6 = vcmp.eq.f32.partialorder %v344_v28, 8.507059e+37 }
 0x16b   : > { %v498_v18 = vpop.eup %497 }
 0x16c   : > { %v336_v19 = vmul.f32 %v498_v18, %v334_v15  ;;  %vm341_vm3 = vweird.f32 %v498_v18 }
 0x16d   : > { %vm342_vm5 = vmor %vm340_vm4, %vm341_vm3 }
 0x16e   : > { %v337_v22 = vsub.f32 1.0, %v336_v19 }
 0x170   : > { %v338_v27 = vmul.f32 %v498_v18, %v337_v22 }
 0x172   : > { %v339_v31 = vadd.f32 %v498_v18, %v338_v27 }
 0x174   : > { %v343_v36 = vsel %vm342_vm5, %v498_v18, %v339_v31 }
 0x175   : > { %v348_v37 = vsel %vm345_vm6, %v347_v33, %v343_v36 }
 0x176   : > { %v350_v40 = vperm.slane %v348_v37, 0 }
 0x178   : > { %v351_v42 = vmul.f32 %v350_v40, %v558_v4  ;;  %v352_v45 = vmul.f32 %v350_v40, %v561_v5  ;;  %v353_v46 = vmul.f32 %v350_v40, %v564_v6  ;;  %v354_v48 = vmul.f32 %v350_v40, %v567_v7 }
 0x179   : > { %v355_v49 = vmul.f32 %v350_v40, %v576_v11  ;;  %v356_v51 = vmul.f32 %v350_v40, %v581_v14  ;;  %v357_v4 = vmul.f32 %v350_v40, %v586_v17  ;;  %v358_v5 = vmul.f32 %v350_v40, %v591_v20 }
 0x17a   : > { %383 = vst.msk [vmem:[%s726_s30] sm:$0xff] %vm203_vm0, %v351_v42  ;;  %v359_v6 = vmul.f32 %v350_v40, %v596_v23  ;;  %v360_v7 = vmul.f32 %v350_v40, %v601_v26  ;;  %v361_v11 = vmul.f32 %v350_v40, %v606_v29  ;;  %v362_v14 = vmul.f32 %v350_v40, %v611_v32 }
 0x17b   : > { %384 = vst.msk [vmem:[%s726_s30 + $0x8] sm:$0xff] %vm203_vm0, %v352_v45  ;;  %v363_v17 = vmul.f32 %v350_v40, %v616_v35  ;;  %v364_v20 = vmul.f32 %v350_v40, %v621_v38  ;;  %v365_v23 = vmul.f32 %v350_v40, %v626_v41  ;;  %v366_v26 = vmul.f32 %v350_v40, %v631_v44 }
 0x17c   : > { %385 = vst.msk [vmem:[%s726_s30 + $0x10] sm:$0xff] %vm203_vm0, %v353_v46  ;;  %v367_v29 = vmul.f32 %v350_v40, %v636_v47  ;;  %v368_v32 = vmul.f32 %v350_v40, %v641_v50  ;;  %v369_v35 = vmul.f32 %v350_v40, %v646_v53  ;;  %v370_v38 = vmul.f32 %v350_v40, %v651_v56 }
 0x17d   : > { %386 = vst.msk [vmem:[%s726_s30 + $0x18] sm:$0xff] %vm203_vm0, %v354_v48  ;;  %v371_v41 = vmul.f32 %v350_v40, %v656_v59  ;;  %v372_v44 = vmul.f32 %v350_v40, %v661_v62  ;;  %v373_v47 = vmul.f32 %v350_v40, %v666_v1  ;;  %v374_v50 = vmul.f32 %v350_v40, %v671_v8 }
 0x17e   : > { %387 = vst.msk [vmem:[%s726_s30 + $0x20] sm:$0xff] %vm203_vm0, %v355_v49  ;;  %v375_v53 = vmul.f32 %v350_v40, %v676_v12  ;;  %v376_v56 = vmul.f32 %v350_v40, %v681_v16  ;;  %v377_v59 = vmul.f32 %v350_v40, %v686_v21  ;;  %v378_v62 = vmul.f32 %v350_v40, %v691_v25 }
 0x17f   : > { %388 = vst.msk [vmem:[%s726_s30 + $0x28] sm:$0xff] %vm203_vm0, %v356_v51  ;;  %v379_v1 = vmul.f32 %v350_v40, %v696_v30  ;;  %v380_v8 = vmul.f32 %v350_v40, %v701_v34  ;;  %v381_v12 = vmul.f32 %v350_v40, %v706_v39  ;;  %v382_v16 = vmul.f32 %v350_v40, %v711_v43 }
 0x180   : > { %389 = vst.msk [vmem:[%s726_s30 + $0x30] sm:$0xff] %vm203_vm0, %v357_v4 }
 0x181   : > { %390 = vst.msk [vmem:[%s726_s30 + $0x38] sm:$0xff] %vm203_vm0, %v358_v5 }
 0x182   : > { %391 = vst.msk [vmem:[%s726_s30 + $0x40] sm:$0xff] %vm203_vm0, %v359_v6 }
 0x183   : > { %392 = vst.msk [vmem:[%s726_s30 + $0x48] sm:$0xff] %vm203_vm0, %v360_v7 }
 0x184   : > { %393 = vst.msk [vmem:[%s726_s30 + $0x50] sm:$0xff] %vm203_vm0, %v361_v11 }
 0x185   : > { %394 = vst.msk [vmem:[%s726_s30 + $0x58] sm:$0xff] %vm203_vm0, %v362_v14 }
 0x186   : > { %395 = vst.msk [vmem:[%s726_s30 + $0x60] sm:$0xff] %vm203_vm0, %v363_v17 }
 0x187   : > { %396 = vst.msk [vmem:[%s726_s30 + $0x68] sm:$0xff] %vm203_vm0, %v364_v20 }
 0x188   : > { %397 = vst.msk [vmem:[%s726_s30 + $0x70] sm:$0xff] %vm203_vm0, %v365_v23 }
 0x189   : > { %398 = vst.msk [vmem:[%s726_s30 + $0x78] sm:$0xff] %vm203_vm0, %v366_v26 }
 0x18a   : > { %399 = vst.msk [vmem:[%s726_s30 + $0x80] sm:$0xff] %vm203_vm0, %v367_v29 }
 0x18b   : > { %400 = vst.msk [vmem:[%s726_s30 + $0x88] sm:$0xff] %vm203_vm0, %v368_v32 }
 0x18c   : > { %401 = vst.msk [vmem:[%s726_s30 + $0x90] sm:$0xff] %vm203_vm0, %v369_v35 }
 0x18d   : > { %402 = vst.msk [vmem:[%s726_s30 + $0x98] sm:$0xff] %vm203_vm0, %v370_v38 }
 0x18e   : > { %403 = vst.msk [vmem:[%s726_s30 + $0xa0] sm:$0xff] %vm203_vm0, %v371_v41 }
 0x18f   : > { %404 = vst.msk [vmem:[%s726_s30 + $0xa8] sm:$0xff] %vm203_vm0, %v372_v44 }
 0x190   : > { %405 = vst.msk [vmem:[%s726_s30 + $0xb0] sm:$0xff] %vm203_vm0, %v373_v47 }
 0x191   : > { %406 = vst.msk [vmem:[%s726_s30 + $0xb8] sm:$0xff] %vm203_vm0, %v374_v50 }
 0x192   : > { %407 = vst.msk [vmem:[%s726_s30 + $0xc0] sm:$0xff] %vm203_vm0, %v375_v53 }
 0x193   : > { %408 = vst.msk [vmem:[%s726_s30 + $0xc8] sm:$0xff] %vm203_vm0, %v376_v56 }
 0x194   : > { %409 = vst.msk [vmem:[%s726_s30 + $0xd0] sm:$0xff] %vm203_vm0, %v377_v59 }
 0x195   : > { %410 = vst.msk [vmem:[%s726_s30 + $0xd8] sm:$0xff] %vm203_vm0, %v378_v62 }
 0x196   : > { %411 = vst.msk [vmem:[%s726_s30 + $0xe0] sm:$0xff] %vm203_vm0, %v379_v1 }
 0x197   : > { %412 = vst.msk [vmem:[%s726_s30 + $0xe8] sm:$0xff] %vm203_vm0, %v380_v8 }
 0x198   : > { %413 = vst.msk [vmem:[%s726_s30 + $0xf0] sm:$0xff] %vm203_vm0, %v381_v12 }
 0x199   : > { %414 = vst.msk [vmem:[%s726_s30 + $0xf8] sm:$0xff] %vm203_vm0, %v382_v16 }
 0x19a PF: > { %s13_s12 = sadd.s32 1, %s505_s12  }
 0x19b   : > { %p10_p4 = scmp.ge.s32.totalorder %s13_s12, 4  }
 0x19d   :  { %12 = sbr.rel (!%p10_p4) target bundleno = 1 (0x1), region = 62 }

</bundles_post_ra>
